<compile_context>
chip_gen: v5e
topology: v5e:2x2
jax: 0.10.0
libtpu: 0.0.40
codegen_flags: <defaults>
</compile_context>

<pallas_src>
import jax
import jax.numpy as jnp
from jax.experimental import pallas as pl
from jax.experimental.pallas import tpu as pltpu


def _round_up(n, m):
    return ((n + m - 1) // m) * m


def policy_net_kernel(x_ref, w1_ref, b1_ref, w2_ref, b2_ref, o_ref):
    # fc1 + ReLU (MXU matmul, f32 accumulation).
    h = jnp.dot(x_ref[...], w1_ref[...], preferred_element_type=jnp.float32)
    h = jnp.maximum(h + b1_ref[...], 0.0)

    # fc2.
    logits = jnp.dot(h, w2_ref[...], preferred_element_type=jnp.float32) + b2_ref[...]

    # Numerically stable softmax over the action dim.  Exact divide so each
    # row sums to 1 within f32 rounding (approx reciprocal was not tight
    # enough -- see correctness note above).
    m = jnp.max(logits, axis=-1, keepdims=True)
    e = jnp.exp(logits - m)
    denom = jnp.sum(e, axis=-1, keepdims=True)
    o_ref[...] = (e * (1.0 / denom)).astype(o_ref.dtype)


def pack_params(w1, b1, w2, b2, dtype=jnp.float32):
    """One-time packing: PyTorch Linear weights (out, in) -> (in, out), biases
    as (1, out) broadcast rows.  Do this at parameter creation, not per call.
    dtype=jnp.bfloat16 halves HBM traffic on v6e/v7x (MXU accumulates in f32);
    the default f32 matches the PyTorch reference closely."""
    return (
        jnp.asarray(w1.T, dtype=dtype),               # (state_dim, hidden_dim)
        jnp.asarray(b1.reshape(1, -1), dtype=dtype),  # (1, hidden_dim)
        jnp.asarray(w2.T, dtype=dtype),               # (hidden_dim, action_dim)
        jnp.asarray(b2.reshape(1, -1), dtype=dtype),  # (1, action_dim)
    )


def _xla_forward(x, packed_params):
    """Plain-XLA path for tiny batches (fuses into the caller's graph)."""
    w1_t, b1_r, w2_t, b2_r = packed_params
    h = jnp.maximum(jnp.dot(x, w1_t) + b1_r, 0.0)
    logits = jnp.dot(h, w2_t) + b2_r
    return jax.nn.softmax(logits, axis=-1)


def policy_net_forward(x, packed_params, *, block_b=4096, min_pallas_batch=8):
    """x: (B, state_dim); packed_params from pack_params().
    Returns (B, action_dim) probabilities (rows sum to 1)."""
    w1_t, b1_r, w2_t, b2_r = packed_params
    B, state_dim = x.shape
    hidden_dim = w1_t.shape[1]
    action_dim = w2_t.shape[1]

    # Tiny batches (single-state RL inference): pallas_call fixed overhead
    # dominates -- bypass the kernel entirely.
    if B < min_pallas_batch:
        return _xla_forward(x, packed_params)

    # Batch tile: multiple of 8 (f32 sublane).  Capped so the grid keeps >= 4
    # steps for large B (v7x dual-TC sharding) while being as big as possible
    # (<= block_b rows) to amortize per-step overhead.  Even at tb=8192 the
    # double-buffered x/out tiles are well under 1 MiB -- far inside v7x's
    # 64 MiB VMEM.
    tb = max(8, min(block_b, _round_up(pl.cdiv(B, 4), 8)))
    grid = (pl.cdiv(B, tb),)  # ragged last block: OOB rows are never stored

    return pl.pallas_call(
        policy_net_kernel,
        out_shape=jax.ShapeDtypeStruct((B, action_dim), jnp.float32),
        grid=grid,
        in_specs=[
            # x: tiled along the batch axis.
            pl.BlockSpec((tb, state_dim), lambda i: (i, 0)),
            # Weights / biases: constant index maps -> VMEM-resident across
            # all batch tiles (no re-DMA per grid step).
            pl.BlockSpec((state_dim, hidden_dim), lambda i: (0, 0)),
            pl.BlockSpec((1, hidden_dim), lambda i: (0, 0)),
            pl.BlockSpec((hidden_dim, action_dim), lambda i: (0, 0)),
            pl.BlockSpec((1, action_dim), lambda i: (0, 0)),
        ],
        out_specs=pl.BlockSpec((tb, action_dim), lambda i: (i, 0)),
        compiler_params=pltpu.CompilerParams(
            # Independent batch tiles -> shard across TensorCores (v7x).
            dimension_semantics=("parallel",),
        ),
    )(x, w1_t, b1_r, w2_t, b2_r)


def reference_forward(x, w1, b1, w2, b2):
    h = jnp.maximum(x @ w1.T + b1, 0.0)
    logits = h @ w2.T + b2
    return jax.nn.softmax(logits, axis=1)


if __name__ == "__main__":
    # Small shapes consistent with the module: Linear -> ReLU -> Linear -> softmax.
    batch = 8
    state_dim = 4
    hidden_dim = 32
    action_dim = 2

    key = jax.random.PRNGKey(0)
    kx, kw1, kb1, kw2, kb2, kx2 = jax.random.split(key, 6)

    x = jax.random.normal(kx, (batch, state_dim), dtype=jnp.float32)
    # Deterministic synthetic parameters (PyTorch Linear weight shape = (out, in)).
    w1 = 0.1 * jax.random.normal(kw1, (hidden_dim, state_dim), dtype=jnp.float32)
    b1 = 0.1 * jax.random.normal(kb1, (hidden_dim,), dtype=jnp.float32)
    w2 = 0.1 * jax.random.normal(kw2, (action_dim, hidden_dim), dtype=jnp.float32)
    b2 = 0.1 * jax.random.normal(kb2, (action_dim,), dtype=jnp.float32)

    # Pack once (amortized outside the per-call path).
    params = pack_params(w1, b1, w2, b2)

    TOL = 2e-3       # matmul-order / exp rounding differences vs the XLA ref
    SUM_TOL = 1e-4   # exact divide -> rows sum to 1 within f32 rounding

    # 1) Small batch through the Pallas kernel (single tile).
    out = jax.block_until_ready(policy_net_forward(x, params))
    ref = reference_forward(x, w1, b1, w2, b2)
    assert out.shape == (batch, action_dim)
    assert jnp.allclose(jnp.sum(out, axis=1), 1.0, atol=SUM_TOL)
    assert jnp.allclose(out, ref, atol=TOL, rtol=TOL)

    # 2) Non-multiple batch: ragged grid (4 tiles of 32 rows), no wrapper pad,
    #    no output slice.  Exercises multi-tile pipelining + clipped last block.
    batch2 = 100
    x2 = jax.random.normal(kx2, (batch2, state_dim), dtype=jnp.float32)
    out2 = jax.block_until_ready(policy_net_forward(x2, params))
    ref2 = reference_forward(x2, w1, b1, w2, b2)
    assert out2.shape == (batch2, action_dim)
    assert jnp.allclose(jnp.sum(out2, axis=1), 1.0, atol=SUM_TOL)
    assert jnp.allclose(out2, ref2, atol=TOL, rtol=TOL)

    # 3) Tiny-batch XLA fallback path (B < min_pallas_batch).
    out3 = jax.block_until_ready(policy_net_forward(x[:2], params))
    assert out3.shape == (2, action_dim)
    assert jnp.allclose(out3, ref[:2], atol=TOL, rtol=TOL)

    print("KERNEL_OK")
</pallas_src>

<mosaic_0001>
module attributes {stable_mosaic.version = 11 : i64} {
  func.func @policy_net_kernel(%arg0: i32, %arg1: memref<8x4xf32, #tpu.memory_space<vmem>>, %arg2: memref<4x32xf32, #tpu.memory_space<vmem>>, %arg3: memref<1x32xf32, #tpu.memory_space<vmem>>, %arg4: memref<32x2xf32, #tpu.memory_space<vmem>>, %arg5: memref<1x2xf32, #tpu.memory_space<vmem>>, %arg6: memref<8x2xf32, #tpu.memory_space<vmem>>) attributes {dimension_semantics = [#tpu.dimension_semantics<parallel>], iteration_bounds = array<i64: 1>, scalar_prefetch = 0 : i64, scratch_operands = 0 : i64, tpu.core_type = #tpu.core_type<tc>, window_params = [{transform_indices = @transform_0, window_bounds = array<i64: 8, 4>}, {pipeline_mode = #tpu.pipeline_mode<synchronous>, transform_indices = @transform_1, window_bounds = array<i64: 4, 32>}, {pipeline_mode = #tpu.pipeline_mode<synchronous>, transform_indices = @transform_2, window_bounds = array<i64: 1, 32>}, {pipeline_mode = #tpu.pipeline_mode<synchronous>, transform_indices = @transform_3, window_bounds = array<i64: 32, 2>}, {pipeline_mode = #tpu.pipeline_mode<synchronous>, transform_indices = @transform_4, window_bounds = array<i64: 1, 2>}, {transform_indices = @transform_5, window_bounds = array<i64: 8, 2>}]} {
    %c0 = arith.constant 0 : index
    %c0_0 = arith.constant 0 : index
    %0 = vector.load %arg1[%c0, %c0_0] : memref<8x4xf32, #tpu.memory_space<vmem>>, vector<8x4xf32>
    %c0_1 = arith.constant 0 : index
    %c0_2 = arith.constant 0 : index
    %1 = vector.load %arg2[%c0_1, %c0_2] : memref<4x32xf32, #tpu.memory_space<vmem>>, vector<4x32xf32>
    %cst = arith.constant dense<0.000000e+00> : vector<8x32xf32>
    %2 = tpu.matmul %0, %1, %cst {dimension_numbers = #tpu.dot_dimension_numbers<[1], [0], [0], [1], [0, 0, 1, 1], [], []>} : vector<8x4xf32>, vector<4x32xf32>, vector<8x32xf32> -> vector<8x32xf32>
    %c0_3 = arith.constant 0 : index
    %c0_4 = arith.constant 0 : index
    %3 = vector.load %arg3[%c0_3, %c0_4] : memref<1x32xf32, #tpu.memory_space<vmem>>, vector<1x32xf32>
    %4 = vector.broadcast %3 : vector<1x32xf32> to vector<8x32xf32>
    %5 = arith.addf %2, %4 : vector<8x32xf32>
    %cst_5 = arith.constant 0.000000e+00 : f32
    %6 = vector.broadcast %cst_5 : f32 to vector<8x32xf32>
    %7 = arith.maximumf %5, %6 : vector<8x32xf32>
    %c0_6 = arith.constant 0 : index
    %c0_7 = arith.constant 0 : index
    %8 = vector.load %arg4[%c0_6, %c0_7] : memref<32x2xf32, #tpu.memory_space<vmem>>, vector<32x2xf32>
    %cst_8 = arith.constant dense<0.000000e+00> : vector<8x2xf32>
    %9 = tpu.matmul %7, %8, %cst_8 {dimension_numbers = #tpu.dot_dimension_numbers<[1], [0], [0], [1], [0, 0, 1, 1], [], []>} : vector<8x32xf32>, vector<32x2xf32>, vector<8x2xf32> -> vector<8x2xf32>
    %c0_9 = arith.constant 0 : index
    %c0_10 = arith.constant 0 : index
    %10 = vector.load %arg5[%c0_9, %c0_10] : memref<1x2xf32, #tpu.memory_space<vmem>>, vector<1x2xf32>
    %11 = vector.broadcast %10 : vector<1x2xf32> to vector<8x2xf32>
    %12 = arith.addf %9, %11 : vector<8x2xf32>
    %cst_11 = arith.constant dense<0xFF800000> : vector<8xf32>
    %13 = vector.multi_reduction <maximumf>, %12, %cst_11 [1] : vector<8x2xf32> to vector<8xf32>
    %14 = vector.shape_cast %13 : vector<8xf32> to vector<8x1xf32>
    %15 = vector.broadcast %14 : vector<8x1xf32> to vector<8x2xf32>
    %16 = arith.subf %12, %15 : vector<8x2xf32>
    %17 = math.exp %16 : vector<8x2xf32>
    %cst_12 = arith.constant dense<0.000000e+00> : vector<8xf32>
    %18 = vector.multi_reduction <add>, %17, %cst_12 [1] : vector<8x2xf32> to vector<8xf32>
    %19 = vector.shape_cast %18 : vector<8xf32> to vector<8x1xf32>
    %cst_13 = arith.constant 1.000000e+00 : f32
    %20 = vector.broadcast %cst_13 : f32 to vector<8x1xf32>
    %21 = arith.divf %20, %19 : vector<8x1xf32>
    %22 = vector.broadcast %21 : vector<8x1xf32> to vector<8x2xf32>
    %23 = arith.mulf %17, %22 : vector<8x2xf32>
    %c0_14 = arith.constant 0 : index
    %c0_15 = arith.constant 0 : index
    %24 = vector.load %arg6[%c0_14, %c0_15] : memref<8x2xf32, #tpu.memory_space<vmem>>, vector<8x2xf32>
    tpu.vector_store %arg6[%c0_14, %c0_15], %23 {strides = array<i32>} : memref<8x2xf32, #tpu.memory_space<vmem>>, vector<8x2xf32>,
    return
  }
  func.func @transform_0(%arg0: i32) -> (i32, i32) {
    %c0_i32 = arith.constant 0 : i32
    %c0_i32_0 = arith.constant 0 : i32
    return %arg0, %c0_i32 : i32, i32
  }
  func.func @transform_1(%arg0: i32) -> (i32, i32) {
    %c0_i32 = arith.constant 0 : i32
    %c0_i32_0 = arith.constant 0 : i32
    %c0_i32_1 = arith.constant 0 : i32
    return %c0_i32, %c0_i32_0 : i32, i32
  }
  func.func @transform_2(%arg0: i32) -> (i32, i32) {
    %c0_i32 = arith.constant 0 : i32
    %c0_i32_0 = arith.constant 0 : i32
    %c0_i32_1 = arith.constant 0 : i32
    return %c0_i32, %c0_i32_0 : i32, i32
  }
  func.func @transform_3(%arg0: i32) -> (i32, i32) {
    %c0_i32 = arith.constant 0 : i32
    %c0_i32_0 = arith.constant 0 : i32
    %c0_i32_1 = arith.constant 0 : i32
    return %c0_i32, %c0_i32_0 : i32, i32
  }
  func.func @transform_4(%arg0: i32) -> (i32, i32) {
    %c0_i32 = arith.constant 0 : i32
    %c0_i32_0 = arith.constant 0 : i32
    %c0_i32_1 = arith.constant 0 : i32
    return %c0_i32, %c0_i32_0 : i32, i32
  }
  func.func @transform_5(%arg0: i32) -> (i32, i32) {
    %c0_i32 = arith.constant 0 : i32
    %c0_i32_0 = arith.constant 0 : i32
    return %arg0, %c0_i32 : i32, i32
  }
}

</mosaic_0001>

<bundles_post_ra>
// kernel: tpu_custom_call.1
= control target key start
LH: loop header
LB: loop body
LE: loop exit
PB: predicated region body
PF: predicated region fallthrough
CT: control target
= control target key end

     0   :  { %vm30_vm0 = vcmask 1043456   ;;  %vm26_vm1 = vcmask 31744   ;;  %vm63_vm2 = vcmask 261120   ;;  %vm87_vm3 = vcmask 15360   ;;  %s187_s1 = inlined_call_operand.vmem [shape: f32[4,32], index: 1, kind: input, shape index: {}]   ;;  %s188_s0 = inlined_call_operand.vmem [shape: f32[8,4], index: 0, kind: input, shape index: {}]   ;;  %s189_s3 = inlined_call_operand.vmem [shape: f32[32,2], index: 3, kind: input, shape index: {}]   ;;  %s190_s2 = inlined_call_operand.vmem [shape: f32[1,32], index: 2, kind: input, shape index: {}]   ;;  %s191_s4 = inlined_call_operand.vmem [shape: f32[1,2], index: 4, kind: input, shape index: {}]   ;;  %s192_s5 = inlined_call_operand.vmem [shape: f32[8,2], index: 5, kind: output, shape index: {}]  }
   0x1   :  { %v21_v0 = vld [vmem:[%s187_s1] sm:$0xf]  ;;  %v58_v2 = vld [vmem:[%s189_s3 + $0x18] sm:$0xff]  ;;  %v57_v3 = vld [vmem:[%s189_s3 + $0x10] sm:$0xff] }
   0x2   :  { %v20_v1 = vld [vmem:[%s188_s0] sm:$0xff]  ;;  %118 = vmatpush.msk.msra.mxu0 %vm30_vm0, %v21_v0  ;;  %79 = vmatpush.msra.mxu1 %v58_v2  ;;  %v56_v4 = vld [vmem:[%s189_s3 + $0x8] sm:$0xff] }
   0x3   :  { %119 = vmatmul.msk.f32.vlgmr.msra.gmra.mxu0 %vm26_vm1, %v20_v1  ;;  %v55_v5 = vld [vmem:[%s189_s3] sm:$0xff] }
   0x4   :  { %80 = vmatpush.msra.mxu1 %v57_v3  ;;  %v121_v6 = vld [vmem:[%s190_s2] ss:$0 sm:$0xff] }
   0x5   :  { %v122_v10 = vld [vmem:[%s191_s4] ss:$0 sm:$0xff] }
   0x6   :  { %81 = vmatpush.msra.mxu1 %v56_v4 }
   0x8   :  { %82 = vmatpush.msra.mxu1 %v55_v5 }
  0x80   :  { %v51_v7 = vpop.f32.mrf.mxu0 }
  0x81   :  { %v52_v8 = vadd.f32 %v121_v6, %v51_v7 }
  0x83   :  { %v54_v9 = vmax.f32 %v52_v8, 0.0 }
  0x85   :  { %120 = vmatmul.msk.f32.vlgmr.msra.gmra.mxu1 %vm63_vm2, %v54_v9 }
 0x102   :  { %v84_v11 = vpop.f32.mrf.mxu1 }
 0x103   :  { %v85_v12 = vadd.f32 %v122_v10, %v84_v11 }
 0x105   :  { %v88_v13 = vsel %vm87_vm3, %v85_v12, -inf }
 0x106   :  { %89 = vmax.xlane.f32.xlu0 %v88_v13 }
 0x179   :  { %v90_v14 = vpop.xlane.xlu0 %89 }
 0x17a   :  { %v91_v15 = vsub.f32 %v85_v12, %v90_v14 }
 0x17c   :  { %v92_v16 = vmul.f32 1.442695, %v91_v15 }
 0x17e   :  { %123 = vpow2.f32 %v92_v16 }
 0x184   :  { %v124_v17 = vpop.eup %123 }
 0x185   :  { %v94_v18 = vsel %vm87_vm3, %v124_v17, 0.0 }
 0x186   :  { %95 = vadd.xlane.f32.xlu0 %v94_v18 }
 0x1f9   :  { %v96_v19 = vpop.xlane.xlu0 %95 }
 0x1fa   :  { %125 = vrcp.f32 %v96_v19  ;;  %v108_v23 = vand.u32 2147483648, %v96_v19  ;;  %v106_v25 = vand.u32 2147483647, %v96_v19  ;;  %vm102_vm5 = vweird.f32 %v96_v19 }
 0x1fc   :  { %v109_v27 = vor.u32 1.1754944e-38, %v108_v23  ;;  %vm107_vm7 = vcmp.eq.f32.partialorder %v106_v25, 8.507059e+37 }
 0x200   :  { %v126_v20 = vpop.eup %125 }
 0x201   :  { %v98_v21 = vmul.f32 %v126_v20, %v96_v19  ;;  %vm103_vm4 = vweird.f32 %v126_v20 }
 0x202   :  { %vm104_vm6 = vmor %vm102_vm5, %vm103_vm4 }
 0x203   :  { %v99_v22 = vsub.f32 1.0, %v98_v21 }
 0x205   :  { %v100_v24 = vmul.f32 %v126_v20, %v99_v22 }
 0x207   :  { %v101_v26 = vadd.f32 %v126_v20, %v100_v24 }
 0x209   :  { %v105_v28 = vsel %vm104_vm6, %v126_v20, %v101_v26 }
 0x20a   :  { %v110_v29 = vsel %vm107_vm7, %v109_v27, %v105_v28 }
 0x20b   :  { %v112_v30 = vmul.f32 %v124_v17, %v110_v29 }
 0x20d   :  { %113 = vst.msk [vmem:[%s192_s5] sm:$0xff] %vm87_vm3, %v112_v30 }

</bundles_post_ra>
